<compile_context>
chip_gen: v5e
topology: v5e:2x2
jax: 0.10.0
libtpu: 0.0.40
codegen_flags: <defaults>
</compile_context>

<pallas_src>
import functools

import jax
import jax.numpy as jnp
from jax.experimental import pallas as pl
from jax.experimental.pallas import tpu as pltpu


def _round_up(x, m):
    return ((x + m - 1) // m) * m


def _elmo_head_kernel(reps_ref, w2s_ref, beff_ref, out_ref):
    """Fused (layers2one folded) projection for one row tile.

    reps_ref : VMEM (L, tm, D)        float32  stacked layer representations
    w2s_ref  : VMEM (L, D, out_pad)   float32  per-layer pre-scaled projection
    beff_ref : VMEM (1, out_pad)      float32  folded bias (b2 + b1 * colsum(w2^T))
    out_ref  : VMEM (tm, out_pad)     float32
    """
    num_layers = reps_ref.shape[0]
    acc = jnp.dot(reps_ref[0], w2s_ref[0], preferred_element_type=jnp.float32)
    for l in range(1, num_layers):
        acc = acc + jnp.dot(reps_ref[l], w2s_ref[l],
                            preferred_element_type=jnp.float32)
    out_ref[...] = (acc + beff_ref[...]).astype(out_ref.dtype)


@functools.partial(jax.jit, static_argnames=("tm",))
def elmo_head(elmo_reps_lmd, w1, b1, w2, b2, *, tm=512):
    """Fused layers2one + optLinear.

    elmo_reps_lmd: (L, M, D) float32   layer-major stacked ELMo reps
    w1: (L,)  b1: (1,)                 layers2one (Linear(L, 1)) params
    w2: (out_dim, D)  b2: (out_dim,)   optLinear  (Linear(D, out_dim)) params
    returns: (M, out_dim) float32
    """
    L, M, D = elmo_reps_lmd.shape
    out_dim = w2.shape[0]

    # Lane-dense output: pad the projection width to a multiple of 128.
    out_pad = _round_up(out_dim, 128)

    # Fold layers2one into the matmul:
    #   mix = sum_l w1[l]*reps[l] + b1
    #   out = mix @ w2^T + b2
    #       = sum_l reps[l] @ (w1[l]*w2^T) + (b2 + b1 * w2^T.sum(axis=0))
    w2t = jnp.transpose(w2)                                  # (D, out_dim)
    w2t_p = jnp.zeros((D, out_pad), jnp.float32).at[:, :out_dim].set(w2t)
    b2_p = jnp.zeros((out_pad,), jnp.float32).at[:out_dim].set(b2)
    w2_scaled = w1[:, None, None] * w2t_p[None]              # (L, D, out_pad)
    b_eff = (b2_p + b1[0] * w2t_p.sum(axis=0)).reshape(1, out_pad)

    # Row tiling: shrink the tile for small problems, pad M up to a multiple.
    tm_eff = max(8, min(tm, _round_up(M, 8)))
    m_pad = _round_up(M, tm_eff)
    if m_pad != M:
        reps = jnp.zeros((L, m_pad, D), elmo_reps_lmd.dtype)
        reps = reps.at[:, :M, :].set(elmo_reps_lmd)
    else:
        reps = elmo_reps_lmd

    grid = (m_pad // tm_eff,)
    grid_spec = pltpu.PrefetchScalarGridSpec(
        num_scalar_prefetch=0,
        grid=grid,
        in_specs=[
            # (L, tm, D) tile of the stacked representations.
            pl.BlockSpec((L, tm_eff, D), lambda i: (0, i, 0)),
            # Resident pre-scaled projection weights + folded bias.
            pl.BlockSpec((L, D, out_pad), lambda i: (0, 0, 0)),
            pl.BlockSpec((1, out_pad), lambda i: (0, 0)),
        ],
        out_specs=pl.BlockSpec((tm_eff, out_pad), lambda i: (i, 0)),
    )

    cost = pl.CostEstimate(
        flops=2 * L * m_pad * D * out_pad,
        transcendentals=0,
        bytes_accessed=(L * m_pad * D + L * D * out_pad + out_pad
                        + m_pad * out_pad) * 4,
    )

    out = pl.pallas_call(
        _elmo_head_kernel,
        out_shape=jax.ShapeDtypeStruct((m_pad, out_pad), jnp.float32),
        grid_spec=grid_spec,
        compiler_params=pltpu.CompilerParams(
            dimension_semantics=("parallel",)),
        cost_estimate=cost,
    )(reps, w2_scaled, b_eff)

    # Slice padded rows / padded lanes back off.
    return out[:M, :out_dim]


def get_elmo_forward(elmo_reps_lbtd, mask, params, *, tm=512):
    """JAX-side glue mirroring getElmo.forward.

    elmo_reps_lbtd: (L, B, T, D) -- ELMo layer representations stacked on
                    axis 0 (layer-major), so the kernel layout is a free
                    reshape (no full-tensor transpose before the kernel).
    mask:           (B, T) int32 -- ELMo's token mask.
    """
    L, B, T, D = elmo_reps_lbtd.shape
    reps_lmd = elmo_reps_lbtd.reshape(L, B * T, D)
    hidden = elmo_head(reps_lmd,
                       params["w1"], params["b1"],
                       params["w2"], params["b2"], tm=tm)
    out_dim = params["w2"].shape[0]
    return hidden.reshape(B, T, out_dim), mask


def init_params(key, layer=2, in_dim=1024, out_dim=100):
    """Deterministic PyTorch-Linear-style init (uniform +/- 1/sqrt(fan_in))."""
    k1, k2, k3, k4 = jax.random.split(key, 4)
    lim1 = 1.0 / jnp.sqrt(jnp.float32(layer))
    lim2 = 1.0 / jnp.sqrt(jnp.float32(in_dim))
    return {
        # layers2one: Linear(layer, 1) -> weight (1, layer) flattened to (layer,)
        "w1": jax.random.uniform(k1, (layer,), jnp.float32, -lim1, lim1),
        "b1": jax.random.uniform(k2, (1,), jnp.float32, -lim1, lim1),
        # optLinear: Linear(1024, out_dim) -> weight (out_dim, 1024)
        "w2": jax.random.uniform(k3, (out_dim, in_dim), jnp.float32, -lim2, lim2),
        "b2": jax.random.uniform(k4, (out_dim,), jnp.float32, -lim2, lim2),
    }


if __name__ == "__main__":
    B, T, D, L, OUT = 2, 8, 1024, 2, 100

    key = jax.random.PRNGKey(0)
    k_reps, k_params = jax.random.split(key)

    # Synthetic stand-in for the (untranslatable) pretrained ELMo encoder
    # output, produced layer-major (L, B, T, D) so no transpose is needed.
    elmo_reps = jax.random.normal(k_reps, (L, B, T, D), jnp.float32)
    mask = jnp.ones((B, T), jnp.int32)

    params = init_params(k_params, layer=L, in_dim=D, out_dim=OUT)

    hidden, out_mask = get_elmo_forward(elmo_reps, mask, params)
    hidden = jax.block_until_ready(hidden)

    # Pure-JAX reference check of the head (layers2one + optLinear).
    ref_mix = jnp.einsum("lbtd,l->btd", elmo_reps, params["w1"]) + params["b1"][0]
    ref_out = jnp.einsum("btd,od->bto", ref_mix, params["w2"]) + params["b2"]
    assert hidden.shape == (B, T, OUT)
    assert out_mask.shape == (B, T)
    assert jnp.allclose(hidden, ref_out, atol=1e-4, rtol=1e-4)

    print("KERNEL_OK")
</pallas_src>

<mosaic_0001>
module attributes {stable_mosaic.version = 11 : i64} {
  func.func @_elmo_head_kernel(%arg0: i32, %arg1: memref<2x16x1024xf32, #tpu.memory_space<vmem>>, %arg2: memref<2x1024x128xf32, #tpu.memory_space<vmem>>, %arg3: memref<1x128xf32, #tpu.memory_space<vmem>>, %arg4: memref<16x128xf32, #tpu.memory_space<vmem>>) attributes {dimension_semantics = [#tpu.dimension_semantics<parallel>], iteration_bounds = array<i64: 1>, scalar_prefetch = 0 : i64, scratch_operands = 0 : i64, tpu.core_type = #tpu.core_type<tc>, window_params = [{transform_indices = @transform_0, window_bounds = array<i64: 2, 16, 1024>}, {pipeline_mode = #tpu.pipeline_mode<synchronous>, transform_indices = @transform_1, window_bounds = array<i64: 2, 1024, 128>}, {pipeline_mode = #tpu.pipeline_mode<synchronous>, transform_indices = @transform_2, window_bounds = array<i64: 1, 128>}, {transform_indices = @transform_3, window_bounds = array<i64: 16, 128>}]} {
    %c0 = arith.constant 0 : index
    %c0_0 = arith.constant 0 : index
    %c0_1 = arith.constant 0 : index
    %0 = vector.load %arg1[%c0, %c0_0, %c0_1] : memref<2x16x1024xf32, #tpu.memory_space<vmem>>, vector<1x16x1024xf32>
    %1 = vector.shape_cast %0 : vector<1x16x1024xf32> to vector<16x1024xf32>
    %c0_2 = arith.constant 0 : index
    %c0_3 = arith.constant 0 : index
    %c0_4 = arith.constant 0 : index
    %2 = vector.load %arg2[%c0_2, %c0_3, %c0_4] : memref<2x1024x128xf32, #tpu.memory_space<vmem>>, vector<1x1024x128xf32>
    %3 = vector.shape_cast %2 : vector<1x1024x128xf32> to vector<1024x128xf32>
    %cst = arith.constant dense<0.000000e+00> : vector<16x128xf32>
    %4 = tpu.matmul %1, %3, %cst {dimension_numbers = #tpu.dot_dimension_numbers<[1], [0], [0], [1], [0, 0, 1, 1], [], []>} : vector<16x1024xf32>, vector<1024x128xf32>, vector<16x128xf32> -> vector<16x128xf32>
    %c1 = arith.constant 1 : index
    %c0_5 = arith.constant 0 : index
    %c0_6 = arith.constant 0 : index
    %5 = vector.load %arg1[%c1, %c0_5, %c0_6] : memref<2x16x1024xf32, #tpu.memory_space<vmem>>, vector<1x16x1024xf32>
    %6 = vector.shape_cast %5 : vector<1x16x1024xf32> to vector<16x1024xf32>
    %c1_7 = arith.constant 1 : index
    %c0_8 = arith.constant 0 : index
    %c0_9 = arith.constant 0 : index
    %7 = vector.load %arg2[%c1_7, %c0_8, %c0_9] : memref<2x1024x128xf32, #tpu.memory_space<vmem>>, vector<1x1024x128xf32>
    %8 = vector.shape_cast %7 : vector<1x1024x128xf32> to vector<1024x128xf32>
    %cst_10 = arith.constant dense<0.000000e+00> : vector<16x128xf32>
    %9 = tpu.matmul %6, %8, %cst_10 {dimension_numbers = #tpu.dot_dimension_numbers<[1], [0], [0], [1], [0, 0, 1, 1], [], []>} : vector<16x1024xf32>, vector<1024x128xf32>, vector<16x128xf32> -> vector<16x128xf32>
    %10 = arith.addf %4, %9 : vector<16x128xf32>
    %c0_11 = arith.constant 0 : index
    %c0_12 = arith.constant 0 : index
    %11 = vector.load %arg3[%c0_11, %c0_12] : memref<1x128xf32, #tpu.memory_space<vmem>>, vector<1x128xf32>
    %12 = vector.broadcast %11 : vector<1x128xf32> to vector<16x128xf32>
    %13 = arith.addf %10, %12 : vector<16x128xf32>
    %c0_13 = arith.constant 0 : index
    %c0_14 = arith.constant 0 : index
    %14 = vector.load %arg4[%c0_13, %c0_14] : memref<16x128xf32, #tpu.memory_space<vmem>>, vector<16x128xf32>
    tpu.vector_store %arg4[%c0_13, %c0_14], %13 {strides = array<i32>} : memref<16x128xf32, #tpu.memory_space<vmem>>, vector<16x128xf32>,
    return
  }
  func.func @transform_0(%arg0: i32) -> (i32, i32, i32) {
    %c0_i32 = arith.constant 0 : i32
    %c0_i32_0 = arith.constant 0 : i32
    %c0_i32_1 = arith.constant 0 : i32
    return %c0_i32, %arg0, %c0_i32_0 : i32, i32, i32
  }
  func.func @transform_1(%arg0: i32) -> (i32, i32, i32) {
    %c0_i32 = arith.constant 0 : i32
    %c0_i32_0 = arith.constant 0 : i32
    %c0_i32_1 = arith.constant 0 : i32
    %c0_i32_2 = arith.constant 0 : i32
    return %c0_i32, %c0_i32_0, %c0_i32_1 : i32, i32, i32
  }
  func.func @transform_2(%arg0: i32) -> (i32, i32) {
    %c0_i32 = arith.constant 0 : i32
    %c0_i32_0 = arith.constant 0 : i32
    %c0_i32_1 = arith.constant 0 : i32
    return %c0_i32, %c0_i32_0 : i32, i32
  }
  func.func @transform_3(%arg0: i32) -> (i32, i32) {
    %c0_i32 = arith.constant 0 : i32
    %c0_i32_0 = arith.constant 0 : i32
    return %arg0, %c0_i32 : i32, i32
  }
}

</mosaic_0001>

<bundles_post_ra>
// kernel: elmo_head.1
= control target key start
LH: loop header
LB: loop body
LE: loop exit
PB: predicated region body
PF: predicated region fallthrough
CT: control target
= control target key end

     0   :  { %s1766_s0 = inlined_call_operand.vmem [shape: f32[2,16,1024], index: 0, kind: input, shape index: {}]   ;;  %s1767_s1 = inlined_call_operand.vmem [shape: f32[2,1024,128], index: 1, kind: input, shape index: {}]   ;;  %s1768_s2 = inlined_call_operand.vmem [shape: f32[1,128], index: 2, kind: input, shape index: {}]   ;;  %s1769_s3 = inlined_call_operand.hbm [shape: f32[16,128], index: 3, kind: output, shape index: {}]  }
   0x1   :  { %v730_v0 = vld [vmem:[%s1767_s1 + $0x478] sm:$0xff]  ;;  %v729_v2 = vld [vmem:[%s1767_s1 + $0x470] sm:$0xff]  ;;  %v728_v6 = vld [vmem:[%s1767_s1 + $0x468] sm:$0xff] }
   0x2   :  { %v762_v1 = vld [vmem:[%s1767_s1 + $0x578] sm:$0xff]  ;;  %305 = vmatpush.msra.mxu0 %v730_v0  ;;  %v761_v4 = vld [vmem:[%s1767_s1 + $0x570] sm:$0xff]  ;;  %v760_v8 = vld [vmem:[%s1767_s1 + $0x568] sm:$0xff] }
   0x3   :  { %351 = vmatpush.msra.mxu2 %v762_v1  ;;  %v746_v3 = vld [vmem:[%s1767_s1 + $0x4f8] sm:$0xff]  ;;  %v745_v7 = vld [vmem:[%s1767_s1 + $0x4f0] sm:$0xff]  ;;  %v744_v10 = vld [vmem:[%s1767_s1 + $0x4e8] sm:$0xff] }
   0x4   :  { %v778_v5 = vld [vmem:[%s1767_s1 + $0x5f8] sm:$0xff]  ;;  %328 = vmatpush.msra.mxu1 %v746_v3  ;;  %306 = vmatpush.msra.mxu0 %v729_v2  ;;  %v777_v9 = vld [vmem:[%s1767_s1 + $0x5f0] sm:$0xff]  ;;  %v727_v11 = vld [vmem:[%s1767_s1 + $0x460] sm:$0xff] }
   0x5   :  { %374 = vmatpush.msra.mxu3 %v778_v5  ;;  %352 = vmatpush.msra.mxu2 %v761_v4  ;;  %v759_v12 = vld [vmem:[%s1767_s1 + $0x560] sm:$0xff]  ;;  %v776_v13 = vld [vmem:[%s1767_s1 + $0x5e8] sm:$0xff]  ;;  %v726_v16 = vld [vmem:[%s1767_s1 + $0x458] sm:$0xff] }
   0x6   :  { %329 = vmatpush.msra.mxu1 %v745_v7  ;;  %307 = vmatpush.msra.mxu0 %v728_v6  ;;  %v743_v14 = vld [vmem:[%s1767_s1 + $0x4e0] sm:$0xff]  ;;  %v758_v17 = vld [vmem:[%s1767_s1 + $0x558] sm:$0xff]  ;;  %v725_v20 = vld [vmem:[%s1767_s1 + $0x450] sm:$0xff] }
   0x7   :  { %375 = vmatpush.msra.mxu3 %v777_v9  ;;  %353 = vmatpush.msra.mxu2 %v760_v8  ;;  %v775_v15 = vld [vmem:[%s1767_s1 + $0x5e0] sm:$0xff]  ;;  %v742_v18 = vld [vmem:[%s1767_s1 + $0x4d8] sm:$0xff]  ;;  %v757_v21 = vld [vmem:[%s1767_s1 + $0x550] sm:$0xff] }
   0x8   :  { %330 = vmatpush.msra.mxu1 %v744_v10  ;;  %308 = vmatpush.msra.mxu0 %v727_v11  ;;  %v774_v19 = vld [vmem:[%s1767_s1 + $0x5d8] sm:$0xff]  ;;  %v741_v22 = vld [vmem:[%s1767_s1 + $0x4d0] sm:$0xff]  ;;  %v724_v24 = vld [vmem:[%s1767_s1 + $0x448] sm:$0xff] }
   0x9   :  { %376 = vmatpush.msra.mxu3 %v776_v13  ;;  %354 = vmatpush.msra.mxu2 %v759_v12  ;;  %v773_v23 = vld [vmem:[%s1767_s1 + $0x5d0] sm:$0xff]  ;;  %v756_v25 = vld [vmem:[%s1767_s1 + $0x548] sm:$0xff]  ;;  %v723_v28 = vld [vmem:[%s1767_s1 + $0x440] sm:$0xff] }
   0xa   :  { %331 = vmatpush.msra.mxu1 %v743_v14  ;;  %309 = vmatpush.msra.mxu0 %v726_v16  ;;  %v740_v26 = vld [vmem:[%s1767_s1 + $0x4c8] sm:$0xff]  ;;  %v755_v29 = vld [vmem:[%s1767_s1 + $0x540] sm:$0xff]  ;;  %v722_v32 = vld [vmem:[%s1767_s1 + $0x438] sm:$0xff] }
   0xb   :  { %377 = vmatpush.msra.mxu3 %v775_v15  ;;  %355 = vmatpush.msra.mxu2 %v758_v17  ;;  %v772_v27 = vld [vmem:[%s1767_s1 + $0x5c8] sm:$0xff]  ;;  %v739_v30 = vld [vmem:[%s1767_s1 + $0x4c0] sm:$0xff]  ;;  %v754_v33 = vld [vmem:[%s1767_s1 + $0x538] sm:$0xff] }
   0xc   :  { %332 = vmatpush.msra.mxu1 %v742_v18  ;;  %310 = vmatpush.msra.mxu0 %v725_v20  ;;  %v771_v31 = vld [vmem:[%s1767_s1 + $0x5c0] sm:$0xff]  ;;  %v738_v34 = vld [vmem:[%s1767_s1 + $0x4b8] sm:$0xff]  ;;  %v721_v36 = vld [vmem:[%s1767_s1 + $0x430] sm:$0xff] }
   0xd   :  { %378 = vmatpush.msra.mxu3 %v774_v19  ;;  %356 = vmatpush.msra.mxu2 %v757_v21  ;;  %v770_v35 = vld [vmem:[%s1767_s1 + $0x5b8] sm:$0xff]  ;;  %v753_v37 = vld [vmem:[%s1767_s1 + $0x530] sm:$0xff]  ;;  %v720_v40 = vld [vmem:[%s1767_s1 + $0x428] sm:$0xff] }
   0xe   :  { %333 = vmatpush.msra.mxu1 %v741_v22  ;;  %311 = vmatpush.msra.mxu0 %v724_v24  ;;  %v737_v38 = vld [vmem:[%s1767_s1 + $0x4b0] sm:$0xff]  ;;  %v752_v41 = vld [vmem:[%s1767_s1 + $0x528] sm:$0xff]  ;;  %v719_v44 = vld [vmem:[%s1767_s1 + $0x420] sm:$0xff] }
   0xf   :  { %379 = vmatpush.msra.mxu3 %v773_v23  ;;  %357 = vmatpush.msra.mxu2 %v756_v25  ;;  %v769_v39 = vld [vmem:[%s1767_s1 + $0x5b0] sm:$0xff]  ;;  %v736_v42 = vld [vmem:[%s1767_s1 + $0x4a8] sm:$0xff]  ;;  %v751_v45 = vld [vmem:[%s1767_s1 + $0x520] sm:$0xff] }
  0x10   :  { %334 = vmatpush.msra.mxu1 %v740_v26  ;;  %312 = vmatpush.msra.mxu0 %v723_v28  ;;  %v768_v43 = vld [vmem:[%s1767_s1 + $0x5a8] sm:$0xff]  ;;  %v735_v46 = vld [vmem:[%s1767_s1 + $0x4a0] sm:$0xff]  ;;  %v718_v48 = vld [vmem:[%s1767_s1 + $0x418] sm:$0xff] }
  0x11   :  { %380 = vmatpush.msra.mxu3 %v772_v27  ;;  %358 = vmatpush.msra.mxu2 %v755_v29  ;;  %v767_v47 = vld [vmem:[%s1767_s1 + $0x5a0] sm:$0xff]  ;;  %v750_v49 = vld [vmem:[%s1767_s1 + $0x518] sm:$0xff]  ;;  %v717_v52 = vld [vmem:[%s1767_s1 + $0x410] sm:$0xff] }
  0x12   :  { %335 = vmatpush.msra.mxu1 %v739_v30  ;;  %313 = vmatpush.msra.mxu0 %v722_v32  ;;  %v734_v50 = vld [vmem:[%s1767_s1 + $0x498] sm:$0xff]  ;;  %v749_v53 = vld [vmem:[%s1767_s1 + $0x510] sm:$0xff]  ;;  %v716_v56 = vld [vmem:[%s1767_s1 + $0x408] sm:$0xff] }
  0x13   :  { %381 = vmatpush.msra.mxu3 %v771_v31  ;;  %359 = vmatpush.msra.mxu2 %v754_v33  ;;  %v766_v51 = vld [vmem:[%s1767_s1 + $0x598] sm:$0xff]  ;;  %v733_v54 = vld [vmem:[%s1767_s1 + $0x490] sm:$0xff]  ;;  %v748_v57 = vld [vmem:[%s1767_s1 + $0x508] sm:$0xff] }
  0x14   :  { %336 = vmatpush.msra.mxu1 %v738_v34  ;;  %314 = vmatpush.msra.mxu0 %v721_v36  ;;  %v765_v55 = vld [vmem:[%s1767_s1 + $0x590] sm:$0xff]  ;;  %v732_v58 = vld [vmem:[%s1767_s1 + $0x488] sm:$0xff]  ;;  %v715_v60 = vld [vmem:[%s1767_s1 + $0x400] sm:$0xff] }
  0x15   :  { %382 = vmatpush.msra.mxu3 %v770_v35  ;;  %360 = vmatpush.msra.mxu2 %v753_v37  ;;  %v764_v59 = vld [vmem:[%s1767_s1 + $0x588] sm:$0xff]  ;;  %v747_v61 = vld [vmem:[%s1767_s1 + $0x500] sm:$0xff]  ;;  %v794_v62 = vld [vmem:[%s1767_s1 + $0x678] sm:$0xff] }
  0x16   :  { %337 = vmatpush.msra.mxu1 %v737_v38  ;;  %315 = vmatpush.msra.mxu0 %v720_v40  ;;  %v826_v63 = vld [vmem:[%s1767_s1 + $0x778] sm:$0xff]  ;;  %v731_v0 = vld [vmem:[%s1767_s1 + $0x480] sm:$0xff]  ;;  %v793_v2 = vld [vmem:[%s1767_s1 + $0x670] sm:$0xff] }
  0x17   :  { %383 = vmatpush.msra.mxu3 %v769_v39  ;;  %361 = vmatpush.msra.mxu2 %v752_v41  ;;  %v763_v1 = vld [vmem:[%s1767_s1 + $0x580] sm:$0xff]  ;;  %v810_v3 = vld [vmem:[%s1767_s1 + $0x6f8] sm:$0xff]  ;;  %v825_v4 = vld [vmem:[%s1767_s1 + $0x770] sm:$0xff] }
  0x18   :  { %338 = vmatpush.msra.mxu1 %v736_v42  ;;  %316 = vmatpush.msra.mxu0 %v719_v44  ;;  %v842_v5 = vld [vmem:[%s1767_s1 + $0x7f8] sm:$0xff]  ;;  %v792_v6 = vld [vmem:[%s1767_s1 + $0x668] sm:$0xff]  ;;  %v809_v7 = vld [vmem:[%s1767_s1 + $0x6f0] sm:$0xff] }
  0x19   :  { %384 = vmatpush.msra.mxu3 %v768_v43  ;;  %362 = vmatpush.msra.mxu2 %v751_v45  ;;  %v824_v8 = vld [vmem:[%s1767_s1 + $0x768] sm:$0xff]  ;;  %v841_v9 = vld [vmem:[%s1767_s1 + $0x7f0] sm:$0xff]  ;;  %v791_v10 = vld [vmem:[%s1767_s1 + $0x660] sm:$0xff] }
  0x1a   :  { %339 = vmatpush.msra.mxu1 %v735_v46  ;;  %317 = vmatpush.msra.mxu0 %v718_v48  ;;  %v808_v11 = vld [vmem:[%s1767_s1 + $0x6e8] sm:$0xff]  ;;  %v823_v12 = vld [vmem:[%s1767_s1 + $0x760] sm:$0xff]  ;;  %v790_v14 = vld [vmem:[%s1767_s1 + $0x658] sm:$0xff] }
  0x1b   :  { %385 = vmatpush.msra.mxu3 %v767_v47  ;;  %363 = vmatpush.msra.mxu2 %v750_v49  ;;  %v840_v13 = vld [vmem:[%s1767_s1 + $0x7e8] sm:$0xff]  ;;  %v807_v15 = vld [vmem:[%s1767_s1 + $0x6e0] sm:$0xff]  ;;  %v822_v16 = vld [vmem:[%s1767_s1 + $0x758] sm:$0xff] }
  0x1c   :  { %340 = vmatpush.msra.mxu1 %v734_v50  ;;  %318 = vmatpush.msra.mxu0 %v717_v52  ;;  %v839_v17 = vld [vmem:[%s1767_s1 + $0x7e0] sm:$0xff]  ;;  %v789_v18 = vld [vmem:[%s1767_s1 + $0x650] sm:$0xff]  ;;  %v806_v19 = vld [vmem:[%s1767_s1 + $0x6d8] sm:$0xff] }
  0x1d   :  { %386 = vmatpush.msra.mxu3 %v766_v51  ;;  %364 = vmatpush.msra.mxu2 %v749_v53  ;;  %v821_v20 = vld [vmem:[%s1767_s1 + $0x750] sm:$0xff]  ;;  %v838_v21 = vld [vmem:[%s1767_s1 + $0x7d8] sm:$0xff]  ;;  %v788_v22 = vld [vmem:[%s1767_s1 + $0x648] sm:$0xff] }
  0x1e   :  { %341 = vmatpush.msra.mxu1 %v733_v54  ;;  %319 = vmatpush.msra.mxu0 %v716_v56  ;;  %v805_v23 = vld [vmem:[%s1767_s1 + $0x6d0] sm:$0xff]  ;;  %v820_v24 = vld [vmem:[%s1767_s1 + $0x748] sm:$0xff]  ;;  %v787_v26 = vld [vmem:[%s1767_s1 + $0x640] sm:$0xff] }
  0x1f   :  { %387 = vmatpush.msra.mxu3 %v765_v55  ;;  %365 = vmatpush.msra.mxu2 %v748_v57  ;;  %v837_v25 = vld [vmem:[%s1767_s1 + $0x7d0] sm:$0xff]  ;;  %v804_v27 = vld [vmem:[%s1767_s1 + $0x6c8] sm:$0xff]  ;;  %v819_v28 = vld [vmem:[%s1767_s1 + $0x740] sm:$0xff] }
  0x20   :  { %342 = vmatpush.msra.mxu1 %v732_v58  ;;  %320 = vmatpush.msra.mxu0 %v715_v60  ;;  %v836_v29 = vld [vmem:[%s1767_s1 + $0x7c8] sm:$0xff]  ;;  %v786_v30 = vld [vmem:[%s1767_s1 + $0x638] sm:$0xff]  ;;  %v803_v31 = vld [vmem:[%s1767_s1 + $0x6c0] sm:$0xff] }
  0x21   :  { %388 = vmatpush.msra.mxu3 %v764_v59  ;;  %366 = vmatpush.msra.mxu2 %v747_v61  ;;  %v818_v32 = vld [vmem:[%s1767_s1 + $0x738] sm:$0xff]  ;;  %v835_v33 = vld [vmem:[%s1767_s1 + $0x7c0] sm:$0xff]  ;;  %v785_v34 = vld [vmem:[%s1767_s1 + $0x630] sm:$0xff] }
  0x22   :  { %397 = vmatpush.msrb.mxu0 %v794_v62  ;;  %343 = vmatpush.msra.mxu1 %v731_v0  ;;  %v802_v35 = vld [vmem:[%s1767_s1 + $0x6b8] sm:$0xff]  ;;  %v817_v36 = vld [vmem:[%s1767_s1 + $0x730] sm:$0xff]  ;;  %v784_v38 = vld [vmem:[%s1767_s1 + $0x628] sm:$0xff] }
  0x23   :  { %443 = vmatpush.msrb.mxu2 %v826_v63  ;;  %389 = vmatpush.msra.mxu3 %v763_v1  ;;  %v834_v37 = vld [vmem:[%s1767_s1 + $0x7b8] sm:$0xff]  ;;  %v801_v39 = vld [vmem:[%s1767_s1 + $0x6b0] sm:$0xff]  ;;  %v816_v40 = vld [vmem:[%s1767_s1 + $0x728] sm:$0xff] }
  0x24   :  { %398 = vmatpush.msrb.mxu0 %v793_v2  ;;  %420 = vmatpush.msrb.mxu1 %v810_v3  ;;  %v833_v41 = vld [vmem:[%s1767_s1 + $0x7b0] sm:$0xff]  ;;  %v783_v43 = vld [vmem:[%s1767_s1 + $0x620] sm:$0xff]  ;;  %v800_v44 = vld [vmem:[%s1767_s1 + $0x6a8] sm:$0xff] }
  0x25   :  { %444 = vmatpush.msrb.mxu2 %v825_v4  ;;  %466 = vmatpush.msrb.mxu3 %v842_v5  ;;  %v701_v42 = vld [vmem:[%s1766_s0 + $0x90] sm:$0xff]  ;;  %v815_v45 = vld [vmem:[%s1767_s1 + $0x720] sm:$0xff]  ;;  %v832_v46 = vld [vmem:[%s1767_s1 + $0x7a8] sm:$0xff] }
  0x26   :  { %399 = vmatpush.msrb.mxu0 %v792_v6  ;;  %421 = vmatpush.msrb.mxu1 %v809_v7  ;;  %v699_v47 = vld [vmem:[%s1766_s0 + $0x80] sm:$0xff]  ;;  %v702_v48 = vld [vmem:[%s1766_s0 + $0x98] sm:$0xff]  ;;  %v700_v53 = vld [vmem:[%s1766_s0 + $0x88] sm:$0xff] }
  0x27   :  { %445 = vmatpush.msrb.mxu2 %v824_v8  ;;  %467 = vmatpush.msrb.mxu3 %v841_v9  ;;  %v782_v49 = vld [vmem:[%s1767_s1 + $0x618] sm:$0xff]  ;;  %v799_v50 = vld [vmem:[%s1767_s1 + $0x6a0] sm:$0xff]  ;;  %v781_v54 = vld [vmem:[%s1767_s1 + $0x610] sm:$0xff] }
  0x28   :  { %400 = vmatpush.msrb.mxu0 %v791_v10  ;;  %422 = vmatpush.msrb.mxu1 %v808_v11  ;;  %v814_v51 = vld [vmem:[%s1767_s1 + $0x718] sm:$0xff]  ;;  %v831_v52 = vld [vmem:[%s1767_s1 + $0x7a0] sm:$0xff]  ;;  %v813_v56 = vld [vmem:[%s1767_s1 + $0x710] sm:$0xff] }
  0x29   :  { %446 = vmatpush.msrb.mxu2 %v823_v12  ;;  %468 = vmatpush.msrb.mxu3 %v840_v13  ;;  %v798_v55 = vld [vmem:[%s1767_s1 + $0x698] sm:$0xff]  ;;  %v780_v58 = vld [vmem:[%s1767_s1 + $0x608] sm:$0xff]  ;;  %v797_v59 = vld [vmem:[%s1767_s1 + $0x690] sm:$0xff] }
  0x2a   :  { %401 = vmatpush.msrb.mxu0 %v790_v14  ;;  %423 = vmatpush.msrb.mxu1 %v807_v15  ;;  %v830_v57 = vld [vmem:[%s1767_s1 + $0x798] sm:$0xff]  ;;  %v812_v60 = vld [vmem:[%s1767_s1 + $0x708] sm:$0xff]  ;;  %v829_v61 = vld [vmem:[%s1767_s1 + $0x790] sm:$0xff] }
  0x2b   :  { %447 = vmatpush.msrb.mxu2 %v822_v16  ;;  %469 = vmatpush.msrb.mxu3 %v839_v17  ;;  %v709_v62 = vld [vmem:[%s1766_s0 + $0xd0] sm:$0xff]  ;;  %v779_v63 = vld [vmem:[%s1767_s1 + $0x600] sm:$0xff]  ;;  %v796_v0 = vld [vmem:[%s1767_s1 + $0x688] sm:$0xff] }
  0x2c   :  { %402 = vmatpush.msrb.mxu0 %v789_v18  ;;  %424 = vmatpush.msrb.mxu1 %v806_v19  ;;  %v811_v1 = vld [vmem:[%s1767_s1 + $0x700] sm:$0xff]  ;;  %v828_v2 = vld [vmem:[%s1767_s1 + $0x788] sm:$0xff]  ;;  %v710_v4 = vld [vmem:[%s1766_s0 + $0xd8] sm:$0xff] }
  0x2d   :  { %448 = vmatpush.msrb.mxu2 %v821_v20  ;;  %470 = vmatpush.msrb.mxu3 %v838_v21  ;;  %v707_v3 = vld [vmem:[%s1766_s0 + $0xc0] sm:$0xff]  ;;  %v46_v5 = vld [vmem:[%s1767_s1 + $0x78] sm:$0xff]  ;;  %v708_v9 = vld [vmem:[%s1766_s0 + $0xc8] sm:$0xff] }
  0x2e   :  { %403 = vmatpush.msrb.mxu0 %v788_v22  ;;  %425 = vmatpush.msrb.mxu1 %v805_v23  ;;  %v78_v6 = vld [vmem:[%s1767_s1 + $0x178] sm:$0xff]  ;;  %v795_v7 = vld [vmem:[%s1767_s1 + $0x680] sm:$0xff] }
  0x2f   :  { %449 = vmatpush.msrb.mxu2 %v820_v24  ;;  %471 = vmatpush.msrb.mxu3 %v837_v25  ;;  %v827_v8 = vld [vmem:[%s1767_s1 + $0x780] sm:$0xff] }
  0x30   :  { %404 = vmatpush.msrb.mxu0 %v787_v26  ;;  %426 = vmatpush.msrb.mxu1 %v804_v27 }
  0x31   :  { %450 = vmatpush.msrb.mxu2 %v819_v28  ;;  %472 = vmatpush.msrb.mxu3 %v836_v29 }
  0x32   :  { %405 = vmatpush.msrb.mxu0 %v786_v30  ;;  %427 = vmatpush.msrb.mxu1 %v803_v31 }
  0x33   :  { %451 = vmatpush.msrb.mxu2 %v818_v32  ;;  %473 = vmatpush.msrb.mxu3 %v835_v33 }
  0x34   :  { %406 = vmatpush.msrb.mxu0 %v785_v34  ;;  %428 = vmatpush.msrb.mxu1 %v802_v35 }
  0x35   :  { %452 = vmatpush.msrb.mxu2 %v817_v36  ;;  %474 = vmatpush.msrb.mxu3 %v834_v37 }
  0x36   :  { %407 = vmatpush.msrb.mxu0 %v784_v38  ;;  %429 = vmatpush.msrb.mxu1 %v801_v39 }
  0x37   :  { %453 = vmatpush.msrb.mxu2 %v816_v40  ;;  %475 = vmatpush.msrb.mxu3 %v833_v41 }
  0x38   :  { %367 = vmatmul.f32.vlgmr.msra.gmra.mxu2 %v701_v42  ;;  %408 = vmatpush.msrb.mxu0 %v783_v43 }
  0x39   :  { %430 = vmatpush.msrb.mxu1 %v800_v44  ;;  %454 = vmatpush.msrb.mxu2 %v815_v45 }
  0x3a   :  { %476 = vmatpush.msrb.mxu3 %v832_v46  ;;  %321 = vmatmul.f32.vlgmr.msra.gmra.mxu0 %v699_v47 }
  0x3b   :  { %390 = vmatmul.f32.vlgmr.msra.gmra.mxu3 %v702_v48  ;;  %409 = vmatpush.msrb.mxu0 %v782_v49 }
  0x3c   :  { %431 = vmatpush.msrb.mxu1 %v799_v50  ;;  %455 = vmatpush.msrb.mxu2 %v814_v51 }
  0x3d   :  { %477 = vmatpush.msrb.mxu3 %v831_v52  ;;  %344 = vmatmul.f32.vlgmr.msra.gmra.mxu1 %v700_v53 }
  0x3e   :  { %410 = vmatpush.msrb.mxu0 %v781_v54  ;;  %432 = vmatpush.msrb.mxu1 %v798_v55 }
  0x3f   :  { %456 = vmatpush.msrb.mxu2 %v813_v56  ;;  %478 = vmatpush.msrb.mxu3 %v830_v57 }
  0x40   :  { %411 = vmatpush.msrb.mxu0 %v780_v58  ;;  %433 = vmatpush.msrb.mxu1 %v797_v59 }
  0x41   :  { %457 = vmatpush.msrb.mxu2 %v812_v60  ;;  %479 = vmatpush.msrb.mxu3 %v829_v61 }
  0x42   :  { %370 = vmatmul.f32.gmra.mxu2 %v709_v62  ;;  %412 = vmatpush.msrb.mxu0 %v779_v63 }
  0x43   :  { %434 = vmatpush.msrb.mxu1 %v796_v0  ;;  %458 = vmatpush.msrb.mxu2 %v811_v1 }
  0x44   :  { %480 = vmatpush.msrb.mxu3 %v828_v2  ;;  %324 = vmatmul.f32.gmra.mxu0 %v707_v3 }
  0x45   :  { %8 = vsyncpa [#allocation3], 0  ;;  %393 = vmatmul.f32.gmra.mxu3 %v710_v4  ;;  %489 = vmatpush.msra.mxu0 %v46_v5  ;;  %v45_v10 = vld [vmem:[%s1767_s1 + $0x70] sm:$0xff]  ;;  %v62_v11 = vld [vmem:[%s1767_s1 + $0xf8] sm:$0xff]  ;;  %s873_s21 = smov [#allocation2]   ;;  %s687_s25 = sshll.u32 %s1769_s3, 4  ;;  %s688_s25 = int_to_ptr.hbm [resolvable:$true] %s687_s25 }
  0x46   :  { %535 = vmatpush.msra.mxu2 %v78_v6  ;;  %435 = vmatpush.msrb.mxu1 %v795_v7  ;;  %v77_v12 = vld [vmem:[%s1767_s1 + $0x170] sm:$0xff]  ;;  %v94_v13 = vld [vmem:[%s1767_s1 + $0x1f8] sm:$0xff]  ;;  %v44_v14 = vld [vmem:[%s1767_s1 + $0x68] sm:$0xff]  ;;  %s685_s22 = sshll.u32 %s873_s21, 4  ;;  %s875_s26 = smov 8   ;;  %s686_s22 = int_to_ptr.vmem [resolvable:$true] %s685_s22 }
  0x47   :  { %481 = vmatpush.msrb.mxu3 %v827_v8  ;;  %347 = vmatmul.f32.gmra.mxu1 %v708_v9  ;;  %v61_v15 = vld [vmem:[%s1767_s1 + $0xf0] sm:$0xff]  ;;  %v76_v16 = vld [vmem:[%s1767_s1 + $0x168] sm:$0xff]  ;;  %v43_v19 = vld [vmem:[%s1767_s1 + $0x60] sm:$0xff] }
  0x48   :  { %490 = vmatpush.msra.mxu0 %v45_v10  ;;  %512 = vmatpush.msra.mxu1 %v62_v11  ;;  %v93_v17 = vld [vmem:[%s1767_s1 + $0x1f0] sm:$0xff]  ;;  %v60_v20 = vld [vmem:[%s1767_s1 + $0xe8] sm:$0xff]  ;;  %v75_v21 = vld [vmem:[%s1767_s1 + $0x160] sm:$0xff] }
  0x49   :  { %536 = vmatpush.msra.mxu2 %v77_v12  ;;  %558 = vmatpush.msra.mxu3 %v94_v13  ;;  %v705_v18 = vld [vmem:[%s1766_s0 + $0xb0] sm:$0xff]  ;;  %v92_v22 = vld [vmem:[%s1767_s1 + $0x1e8] sm:$0xff]  ;;  %v703_v23 = vld [vmem:[%s1766_s0 + $0xa0] sm:$0xff] }
  0x4a   :  { %491 = vmatpush.msra.mxu0 %v44_v14  ;;  %513 = vmatpush.msra.mxu1 %v61_v15  ;;  %v706_v24 = vld [vmem:[%s1766_s0 + $0xb8] sm:$0xff]  ;;  %v59_v26 = vld [vmem:[%s1767_s1 + $0xe0] sm:$0xff]  ;;  %v704_v29 = vld [vmem:[%s1766_s0 + $0xa8] sm:$0xff] }
  0x4b   :  { %537 = vmatpush.msra.mxu2 %v76_v16  ;;  %559 = vmatpush.msra.mxu3 %v93_v17  ;;  %v42_v25 = vld [vmem:[%s1767_s1 + $0x58] sm:$0xff]  ;;  %v91_v28 = vld [vmem:[%s1767_s1 + $0x1e0] sm:$0xff]  ;;  %v41_v30 = vld [vmem:[%s1767_s1 + $0x50] sm:$0xff] }
  0x4c   :  { %459 = vmatmul.f32.vlgmr.msrb.gmra.mxu2 %v705_v18  ;;  %492 = vmatpush.msra.mxu0 %v43_v19  ;;  %v74_v27 = vld [vmem:[%s1767_s1 + $0x158] sm:$0xff]  ;;  %v73_v32 = vld [vmem:[%s1767_s1 + $0x150] sm:$0xff]  ;;  %v40_v34 = vld [vmem:[%s1767_s1 + $0x48] sm:$0xff] }
  0x4d   :  { %514 = vmatpush.msra.mxu1 %v60_v20  ;;  %538 = vmatpush.msra.mxu2 %v75_v21  ;;  %v58_v31 = vld [vmem:[%s1767_s1 + $0xd8] sm:$0xff]  ;;  %v57_v35 = vld [vmem:[%s1767_s1 + $0xd0] sm:$0xff]  ;;  %v72_v36 = vld [vmem:[%s1767_s1 + $0x148] sm:$0xff] }
  0x4e   :  { %560 = vmatpush.msra.mxu3 %v92_v22  ;;  %413 = vmatmul.f32.vlgmr.msrb.gmra.mxu0 %v703_v23  ;;  %v90_v33 = vld [vmem:[%s1767_s1 + $0x1d8] sm:$0xff]  ;;  %v89_v37 = vld [vmem:[%s1767_s1 + $0x1d0] sm:$0xff]  ;;  %v39_v38 = vld [vmem:[%s1767_s1 + $0x40] sm:$0xff] }
  0x4f   :  { %482 = vmatmul.f32.vlgmr.msrb.gmra.mxu3 %v706_v24  ;;  %493 = vmatpush.msra.mxu0 %v42_v25  ;;  %v56_v39 = vld [vmem:[%s1767_s1 + $0xc8] sm:$0xff]  ;;  %v71_v40 = vld [vmem:[%s1767_s1 + $0x140] sm:$0xff]  ;;  %v38_v42 = vld [vmem:[%s1767_s1 + $0x38] sm:$0xff] }
  0x50   :  { %515 = vmatpush.msra.mxu1 %v59_v26  ;;  %539 = vmatpush.msra.mxu2 %v74_v27  ;;  %v88_v41 = vld [vmem:[%s1767_s1 + $0x1c8] sm:$0xff]  ;;  %v55_v43 = vld [vmem:[%s1767_s1 + $0xc0] sm:$0xff]  ;;  %v70_v44 = vld [vmem:[%s1767_s1 + $0x138] sm:$0xff] }
  0x51   :  { %561 = vmatpush.msra.mxu3 %v91_v28  ;;  %436 = vmatmul.f32.vlgmr.msrb.gmra.mxu1 %v704_v29  ;;  %v87_v45 = vld [vmem:[%s1767_s1 + $0x1c0] sm:$0xff]  ;;  %v37_v46 = vld [vmem:[%s1767_s1 + $0x30] sm:$0xff]  ;;  %v54_v47 = vld [vmem:[%s1767_s1 + $0xb8] sm:$0xff] }
  0x52   :  { %494 = vmatpush.msra.mxu0 %v41_v30  ;;  %516 = vmatpush.msra.mxu1 %v58_v31  ;;  %v69_v48 = vld [vmem:[%s1767_s1 + $0x130] sm:$0xff]  ;;  %v86_v49 = vld [vmem:[%s1767_s1 + $0x1b8] sm:$0xff]  ;;  %v36_v50 = vld [vmem:[%s1767_s1 + $0x28] sm:$0xff] }
  0x53   :  { %540 = vmatpush.msra.mxu2 %v73_v32  ;;  %562 = vmatpush.msra.mxu3 %v90_v33  ;;  %v53_v51 = vld [vmem:[%s1767_s1 + $0xb0] sm:$0xff]  ;;  %v68_v52 = vld [vmem:[%s1767_s1 + $0x128] sm:$0xff]  ;;  %v35_v54 = vld [vmem:[%s1767_s1 + $0x20] sm:$0xff] }
  0x54   :  { %495 = vmatpush.msra.mxu0 %v40_v34  ;;  %517 = vmatpush.msra.mxu1 %v57_v35  ;;  %v85_v53 = vld [vmem:[%s1767_s1 + $0x1b0] sm:$0xff]  ;;  %v52_v55 = vld [vmem:[%s1767_s1 + $0xa8] sm:$0xff]  ;;  %v67_v56 = vld [vmem:[%s1767_s1 + $0x120] sm:$0xff] }
  0x55   :  { %541 = vmatpush.msra.mxu2 %v72_v36  ;;  %563 = vmatpush.msra.mxu3 %v89_v37  ;;  %v84_v57 = vld [vmem:[%s1767_s1 + $0x1a8] sm:$0xff]  ;;  %v711_v58 = vld [vmem:[%s1766_s0 + $0xe0] sm:$0xff]  ;;  %v713_v59 = vld [vmem:[%s1766_s0 + $0xf0] sm:$0xff] }
  0x56   :  { %496 = vmatpush.msra.mxu0 %v39_v38  ;;  %518 = vmatpush.msra.mxu1 %v56_v39  ;;  %v34_v60 = vld [vmem:[%s1767_s1 + $0x18] sm:$0xff]  ;;  %v51_v61 = vld [vmem:[%s1767_s1 + $0xa0] sm:$0xff]  ;;  %v712_v0 = vld [vmem:[%s1766_s0 + $0xe8] sm:$0xff] }
  0x57   :  { %542 = vmatpush.msra.mxu2 %v71_v40  ;;  %564 = vmatpush.msra.mxu3 %v88_v41  ;;  %v66_v62 = vld [vmem:[%s1767_s1 + $0x118] sm:$0xff]  ;;  %v83_v63 = vld [vmem:[%s1767_s1 + $0x1a0] sm:$0xff]  ;;  %v33_v2 = vld [vmem:[%s1767_s1 + $0x10] sm:$0xff] }
  0x58   :  { %497 = vmatpush.msra.mxu0 %v38_v42  ;;  %519 = vmatpush.msra.mxu1 %v55_v43  ;;  %v714_v1 = vld [vmem:[%s1766_s0 + $0xf8] sm:$0xff]  ;;  %v65_v4 = vld [vmem:[%s1767_s1 + $0x110] sm:$0xff]  ;;  %v32_v6 = vld [vmem:[%s1767_s1 + $0x8] sm:$0xff] }
  0x59   :  { %543 = vmatpush.msra.mxu2 %v70_v44  ;;  %565 = vmatpush.msra.mxu3 %v87_v45  ;;  %v50_v3 = vld [vmem:[%s1767_s1 + $0x98] sm:$0xff]  ;;  %v49_v7 = vld [vmem:[%s1767_s1 + $0x90] sm:$0xff]  ;;  %v64_v8 = vld [vmem:[%s1767_s1 + $0x108] sm:$0xff] }
  0x5a   :  { %498 = vmatpush.msra.mxu0 %v37_v46  ;;  %520 = vmatpush.msra.mxu1 %v54_v47  ;;  %v82_v5 = vld [vmem:[%s1767_s1 + $0x198] sm:$0xff]  ;;  %v81_v9 = vld [vmem:[%s1767_s1 + $0x190] sm:$0xff]  ;;  %v31_v10 = vld [vmem:[%s1767_s1] sm:$0xff] }
  0x5b   :  { %544 = vmatpush.msra.mxu2 %v69_v48  ;;  %566 = vmatpush.msra.mxu3 %v86_v49  ;;  %v48_v11 = vld [vmem:[%s1767_s1 + $0x88] sm:$0xff]  ;;  %v63_v12 = vld [vmem:[%s1767_s1 + $0x100] sm:$0xff]  ;;  %v17_v15 = vld [vmem:[%s1766_s0 + $0x10] sm:$0xff] }
  0x5c   :  { %499 = vmatpush.msra.mxu0 %v36_v50  ;;  %521 = vmatpush.msra.mxu1 %v53_v51  ;;  %v80_v13 = vld [vmem:[%s1767_s1 + $0x188] sm:$0xff]  ;;  %v15_v14 = vld [vmem:[%s1766_s0] sm:$0xff]  ;;  %v110_v16 = vld [vmem:[%s1767_s1 + $0x278] sm:$0xff] }
  0x5d   :  { %545 = vmatpush.msra.mxu2 %v68_v52  ;;  %567 = vmatpush.msra.mxu3 %v85_v53  ;;  %v142_v17 = vld [vmem:[%s1767_s1 + $0x378] sm:$0xff]  ;;  %v47_v18 = vld [vmem:[%s1767_s1 + $0x80] sm:$0xff]  ;;  %v16_v20 = vld [vmem:[%s1766_s0 + $0x8] sm:$0xff] }
  0x5e   :  { %500 = vmatpush.msra.mxu0 %v35_v54  ;;  %522 = vmatpush.msra.mxu1 %v52_v55  ;;  %v79_v19 = vld [vmem:[%s1767_s1 + $0x180] sm:$0xff]  ;;  %v18_v21 = vld [vmem:[%s1766_s0 + $0x18] sm:$0xff]  ;;  %v109_v22 = vld [vmem:[%s1767_s1 + $0x270] sm:$0xff] }
  0x5f   :  { %546 = vmatpush.msra.mxu2 %v67_v56  ;;  %568 = vmatpush.msra.mxu3 %v84_v57  ;;  %v126_v23 = vld [vmem:[%s1767_s1 + $0x2f8] sm:$0xff]  ;;  %v141_v24 = vld [vmem:[%s1767_s1 + $0x370] sm:$0xff]  ;;  %v108_v26 = vld [vmem:[%s1767_s1 + $0x268] sm:$0xff] }
  0x60   :  { %416 = vmatmul.f32.gmra.mxu0 %v711_v58  ;;  %462 = vmatmul.f32.gmra.mxu2 %v713_v59  ;;  %v158_v25 = vld [vmem:[%s1767_s1 + $0x3f8] sm:$0xff]  ;;  %v125_v27 = vld [vmem:[%s1767_s1 + $0x2f0] sm:$0xff]  ;;  %v140_v28 = vld [vmem:[%s1767_s1 + $0x368] sm:$0xff] }
  0x61   :  { %501 = vmatpush.msra.mxu0 %v34_v60  ;;  %523 = vmatpush.msra.mxu1 %v51_v61  ;;  %v157_v29 = vld [vmem:[%s1767_s1 + $0x3f0] sm:$0xff]  ;;  %v107_v30 = vld [vmem:[%s1767_s1 + $0x260] sm:$0xff]  ;;  %v124_v31 = vld [vmem:[%s1767_s1 + $0x2e8] sm:$0xff] }
  0x62   :  { %547 = vmatpush.msra.mxu2 %v66_v62  ;;  %569 = vmatpush.msra.mxu3 %v83_v63  ;;  %v139_v32 = vld [vmem:[%s1767_s1 + $0x360] sm:$0xff]  ;;  %v156_v33 = vld [vmem:[%s1767_s1 + $0x3e8] sm:$0xff]  ;;  %v25_v35 = vld [vmem:[%s1766_s0 + $0x50] sm:$0xff] }
  0x63   :  { %439 = vmatmul.f32.gmra.mxu1 %v712_v0  ;;  %485 = vmatmul.f32.gmra.mxu3 %v714_v1  ;;  %v23_v34 = vld [vmem:[%s1766_s0 + $0x40] sm:$0xff]  ;;  %v106_v36 = vld [vmem:[%s1767_s1 + $0x258] sm:$0xff]  ;;  %v24_v40 = vld [vmem:[%s1766_s0 + $0x48] sm:$0xff] }
  0x64   :  { %502 = vmatpush.msra.mxu0 %v33_v2  ;;  %524 = vmatpush.msra.mxu1 %v50_v3  ;;  %v123_v37 = vld [vmem:[%s1767_s1 + $0x2e0] sm:$0xff]  ;;  %v138_v38 = vld [vmem:[%s1767_s1 + $0x358] sm:$0xff]  ;;  %v105_v42 = vld [vmem:[%s1767_s1 + $0x250] sm:$0xff] }
  0x65   :  { %548 = vmatpush.msra.mxu2 %v65_v4  ;;  %570 = vmatpush.msra.mxu3 %v82_v5  ;;  %v155_v39 = vld [vmem:[%s1767_s1 + $0x3e0] sm:$0xff]  ;;  %v26_v41 = vld [vmem:[%s1766_s0 + $0x58] sm:$0xff]  ;;  %v137_v44 = vld [vmem:[%s1767_s1 + $0x350] sm:$0xff] }
  0x66   :  { %503 = vmatpush.msra.mxu0 %v32_v6  ;;  %525 = vmatpush.msra.mxu1 %v49_v7  ;;  %v122_v43 = vld [vmem:[%s1767_s1 + $0x2d8] sm:$0xff]  ;;  %v104_v46 = vld [vmem:[%s1767_s1 + $0x248] sm:$0xff]  ;;  %v121_v47 = vld [vmem:[%s1767_s1 + $0x2d0] sm:$0xff] }
  0x67   :  { %549 = vmatpush.msra.mxu2 %v64_v8  ;;  %571 = vmatpush.msra.mxu3 %v81_v9  ;;  %v154_v45 = vld [vmem:[%s1767_s1 + $0x3d8] sm:$0xff]  ;;  %v136_v48 = vld [vmem:[%s1767_s1 + $0x348] sm:$0xff]  ;;  %v153_v49 = vld [vmem:[%s1767_s1 + $0x3d0] sm:$0xff] }
  0x68   :  { %504 = vmatpush.msra.mxu0 %v31_v10  ;;  %526 = vmatpush.msra.mxu1 %v48_v11  ;;  %v103_v50 = vld [vmem:[%s1767_s1 + $0x240] sm:$0xff]  ;;  %v120_v51 = vld [vmem:[%s1767_s1 + $0x2c8] sm:$0xff]  ;;  %v102_v54 = vld [vmem:[%s1767_s1 + $0x238] sm:$0xff] }
  0x69   :  { %550 = vmatpush.msra.mxu2 %v63_v12  ;;  %572 = vmatpush.msra.mxu3 %v80_v13  ;;  %v135_v52 = vld [vmem:[%s1767_s1 + $0x340] sm:$0xff]  ;;  %v152_v53 = vld [vmem:[%s1767_s1 + $0x3c8] sm:$0xff]  ;;  %v134_v56 = vld [vmem:[%s1767_s1 + $0x338] sm:$0xff] }
  0x6a   :  { %505 = vmatmul.f32.vlgmr.msra.gmra.mxu0 %v15_v14  ;;  %551 = vmatmul.f32.vlgmr.msra.gmra.mxu2 %v17_v15  ;;  %v119_v55 = vld [vmem:[%s1767_s1 + $0x2c0] sm:$0xff]  ;;  %v101_v58 = vld [vmem:[%s1767_s1 + $0x230] sm:$0xff]  ;;  %v118_v59 = vld [vmem:[%s1767_s1 + $0x2b8] sm:$0xff] }
  0x6b   :  { %581 = vmatpush.msrb.mxu0 %v110_v16  ;;  %627 = vmatpush.msrb.mxu2 %v142_v17  ;;  %v151_v57 = vld [vmem:[%s1767_s1 + $0x3c0] sm:$0xff]  ;;  %v133_v60 = vld [vmem:[%s1767_s1 + $0x330] sm:$0xff]  ;;  %v150_v61 = vld [vmem:[%s1767_s1 + $0x3b8] sm:$0xff] }
  0x6c   :  { %527 = vmatpush.msra.mxu1 %v47_v18  ;;  %573 = vmatpush.msra.mxu3 %v79_v19  ;;  %v100_v62 = vld [vmem:[%s1767_s1 + $0x228] sm:$0xff]  ;;  %v117_v63 = vld [vmem:[%s1767_s1 + $0x2b0] sm:$0xff]  ;;  %v99_v2 = vld [vmem:[%s1767_s1 + $0x220] sm:$0xff] }
  0x6d   :  { %528 = vmatmul.f32.vlgmr.msra.gmra.mxu1 %v16_v20  ;;  %574 = vmatmul.f32.vlgmr.msra.gmra.mxu3 %v18_v21  ;;  %v132_v0 = vld [vmem:[%s1767_s1 + $0x328] sm:$0xff]  ;;  %v149_v1 = vld [vmem:[%s1767_s1 + $0x3b0] sm:$0xff]  ;;  %v131_v4 = vld [vmem:[%s1767_s1 + $0x320] sm:$0xff] }
  0x6e   :  { %582 = vmatpush.msrb.mxu0 %v109_v22  ;;  %604 = vmatpush.msrb.mxu1 %v126_v23  ;;  %v116_v3 = vld [vmem:[%s1767_s1 + $0x2a8] sm:$0xff]  ;;  %v98_v6 = vld [vmem:[%s1767_s1 + $0x218] sm:$0xff]  ;;  %v115_v7 = vld [vmem:[%s1767_s1 + $0x2a0] sm:$0xff] }
  0x6f   :  { %628 = vmatpush.msrb.mxu2 %v141_v24  ;;  %650 = vmatpush.msrb.mxu3 %v158_v25  ;;  %v148_v5 = vld [vmem:[%s1767_s1 + $0x3a8] sm:$0xff]  ;;  %v130_v8 = vld [vmem:[%s1767_s1 + $0x318] sm:$0xff]  ;;  %v147_v9 = vld [vmem:[%s1767_s1 + $0x3a0] sm:$0xff] }
  0x70   :  { %583 = vmatpush.msrb.mxu0 %v108_v26  ;;  %605 = vmatpush.msrb.mxu1 %v125_v27  ;;  %v97_v10 = vld [vmem:[%s1767_s1 + $0x210] sm:$0xff]  ;;  %v114_v11 = vld [vmem:[%s1767_s1 + $0x298] sm:$0xff]  ;;  %v96_v14 = vld [vmem:[%s1767_s1 + $0x208] sm:$0xff] }
  0x71   :  { %629 = vmatpush.msrb.mxu2 %v140_v28  ;;  %651 = vmatpush.msrb.mxu3 %v157_v29  ;;  %v129_v12 = vld [vmem:[%s1767_s1 + $0x310] sm:$0xff]  ;;  %v146_v13 = vld [vmem:[%s1767_s1 + $0x398] sm:$0xff]  ;;  %v128_v16 = vld [vmem:[%s1767_s1 + $0x308] sm:$0xff] }
  0x72   :  { %584 = vmatpush.msrb.mxu0 %v107_v30  ;;  %606 = vmatpush.msrb.mxu1 %v124_v31  ;;  %v113_v15 = vld [vmem:[%s1767_s1 + $0x290] sm:$0xff]  ;;  %v95_v18 = vld [vmem:[%s1767_s1 + $0x200] sm:$0xff]  ;;  %v112_v19 = vld [vmem:[%s1767_s1 + $0x288] sm:$0xff] }
  0x73   :  { %630 = vmatpush.msrb.mxu2 %v139_v32  ;;  %652 = vmatpush.msrb.mxu3 %v156_v33  ;;  %v145_v17 = vld [vmem:[%s1767_s1 + $0x390] sm:$0xff]  ;;  %v127_v20 = vld [vmem:[%s1767_s1 + $0x300] sm:$0xff]  ;;  %v144_v21 = vld [vmem:[%s1767_s1 + $0x388] sm:$0xff] }
  0x74   :  { %508 = vmatmul.f32.gmra.mxu0 %v23_v34  ;;  %554 = vmatmul.f32.gmra.mxu2 %v25_v35  ;;  %v19_v22 = vld [vmem:[%s1766_s0 + $0x20] sm:$0xff]  ;;  %v21_v23 = vld [vmem:[%s1766_s0 + $0x30] sm:$0xff]  ;;  %v20_v26 = vld [vmem:[%s1766_s0 + $0x28] sm:$0xff] }
  0x75   :  { %585 = vmatpush.msrb.mxu0 %v106_v36  ;;  %607 = vmatpush.msrb.mxu1 %v123_v37  ;;  %v111_v24 = vld [vmem:[%s1767_s1 + $0x280] sm:$0xff]  ;;  %v22_v27 = vld [vmem:[%s1766_s0 + $0x38] sm:$0xff]  ;;  %v29_v29 = vld [vmem:[%s1766_s0 + $0x70] sm:$0xff] }
  0x76   :  { %631 = vmatpush.msrb.mxu2 %v138_v38  ;;  %653 = vmatpush.msrb.mxu3 %v155_v39  ;;  %v143_v25 = vld [vmem:[%s1767_s1 + $0x380] sm:$0xff]  ;;  %v28_v30 = vld [vmem:[%s1766_s0 + $0x68] sm:$0xff]  ;;  %v30_v31 = vld [vmem:[%s1766_s0 + $0x78] sm:$0xff] }
  0x77   :  { %531 = vmatmul.f32.gmra.mxu1 %v24_v40  ;;  %577 = vmatmul.f32.gmra.mxu3 %v26_v41  ;;  %v27_v28 = vld [vmem:[%s1766_s0 + $0x60] sm:$0xff] }
  0x78   :  { %586 = vmatpush.msrb.mxu0 %v105_v42  ;;  %608 = vmatpush.msrb.mxu1 %v122_v43 }
  0x79   :  { %632 = vmatpush.msrb.mxu2 %v137_v44  ;;  %654 = vmatpush.msrb.mxu3 %v154_v45 }
  0x7a   :  { %587 = vmatpush.msrb.mxu0 %v104_v46  ;;  %609 = vmatpush.msrb.mxu1 %v121_v47 }
  0x7b   :  { %633 = vmatpush.msrb.mxu2 %v136_v48  ;;  %655 = vmatpush.msrb.mxu3 %v153_v49 }
  0x7c   :  { %588 = vmatpush.msrb.mxu0 %v103_v50  ;;  %610 = vmatpush.msrb.mxu1 %v120_v51 }
  0x7d   :  { %634 = vmatpush.msrb.mxu2 %v135_v52  ;;  %656 = vmatpush.msrb.mxu3 %v152_v53 }
  0x7e   :  { %589 = vmatpush.msrb.mxu0 %v102_v54  ;;  %611 = vmatpush.msrb.mxu1 %v119_v55 }
  0x7f   :  { %635 = vmatpush.msrb.mxu2 %v134_v56  ;;  %657 = vmatpush.msrb.mxu3 %v151_v57 }
  0x80   :  { %590 = vmatpush.msrb.mxu0 %v101_v58  ;;  %612 = vmatpush.msrb.mxu1 %v118_v59 }
  0x81   :  { %636 = vmatpush.msrb.mxu2 %v133_v60  ;;  %658 = vmatpush.msrb.mxu3 %v150_v61 }
  0x82   :  { %591 = vmatpush.msrb.mxu0 %v100_v62  ;;  %613 = vmatpush.msrb.mxu1 %v117_v63 }
  0x83   :  { %637 = vmatpush.msrb.mxu2 %v132_v0  ;;  %659 = vmatpush.msrb.mxu3 %v149_v1 }
  0x84   :  { %592 = vmatpush.msrb.mxu0 %v99_v2  ;;  %614 = vmatpush.msrb.mxu1 %v116_v3 }
  0x85   :  { %638 = vmatpush.msrb.mxu2 %v131_v4  ;;  %660 = vmatpush.msrb.mxu3 %v148_v5 }
  0x86   :  { %593 = vmatpush.msrb.mxu0 %v98_v6  ;;  %615 = vmatpush.msrb.mxu1 %v115_v7 }
  0x87   :  { %639 = vmatpush.msrb.mxu2 %v130_v8  ;;  %661 = vmatpush.msrb.mxu3 %v147_v9 }
  0x88   :  { %594 = vmatpush.msrb.mxu0 %v97_v10  ;;  %616 = vmatpush.msrb.mxu1 %v114_v11 }
  0x89   :  { %640 = vmatpush.msrb.mxu2 %v129_v12  ;;  %662 = vmatpush.msrb.mxu3 %v146_v13 }
  0x8a   :  { %595 = vmatpush.msrb.mxu0 %v96_v14  ;;  %617 = vmatpush.msrb.mxu1 %v113_v15 }
  0x8b   :  { %641 = vmatpush.msrb.mxu2 %v128_v16  ;;  %663 = vmatpush.msrb.mxu3 %v145_v17 }
  0x8c   :  { %596 = vmatpush.msrb.mxu0 %v95_v18  ;;  %618 = vmatpush.msrb.mxu1 %v112_v19 }
  0x8d   :  { %642 = vmatpush.msrb.mxu2 %v127_v20  ;;  %664 = vmatpush.msrb.mxu3 %v144_v21  ;;  %v846_v20 = vld [vmem:[%s1768_s2] ss:$0 sm:$0xff]  ;;  %s874_s2 = smov 128  }
  0x8e   :  { %597 = vmatmul.f32.vlgmr.msrb.gmra.mxu0 %v19_v22  ;;  %643 = vmatmul.f32.vlgmr.msrb.gmra.mxu2 %v21_v23 }
  0x8f   :  { %619 = vmatpush.msrb.mxu1 %v111_v24  ;;  %665 = vmatpush.msrb.mxu3 %v143_v25 }
  0x90   :  { %620 = vmatmul.f32.vlgmr.msrb.gmra.mxu1 %v20_v26  ;;  %666 = vmatmul.f32.vlgmr.msrb.gmra.mxu3 %v22_v27 }
  0x96   :  { %600 = vmatmul.f32.gmra.mxu0 %v27_v28  ;;  %646 = vmatmul.f32.gmra.mxu2 %v29_v29 }
  0x98   :  { %623 = vmatmul.f32.gmra.mxu1 %v28_v30  ;;  %669 = vmatmul.f32.gmra.mxu3 %v30_v31 }
  0xb7   :  { %v322_v32 = vpop.f32.mrf.mxu0 }
  0xba   :  { %v345_v33 = vpop.f32.mrf.mxu1 }
  0xbb   :  { %v368_v34 = vpop.f32.mrf.mxu2  ;;  %v346_v40 = vadd.f32 %v345_v33, %v322_v32 }
  0xbd   :  { %v369_v43 = vadd.f32 %v368_v34, %v346_v40 }
  0xbe   :  { %v391_v35 = vpop.f32.mrf.mxu3 }
  0xbf   :  { %v392_v46 = vadd.f32 %v391_v35, %v369_v43 }
  0xc1   :  { %v325_v36 = vpop.f32.mrf.mxu0 }
  0xc4   :  { %v348_v37 = vpop.f32.mrf.mxu1 }
  0xc5   :  { %v371_v38 = vpop.f32.mrf.mxu2  ;;  %v349_v44 = vadd.f32 %v348_v37, %v325_v36 }
  0xc7   :  { %v372_v49 = vadd.f32 %v371_v38, %v349_v44 }
  0xc8   :  { %v394_v39 = vpop.f32.mrf.mxu3 }
  0xc9   :  { %v395_v52 = vadd.f32 %v394_v39, %v372_v49 }
  0xcb   :  { %v414_v41 = vpop.f32.mrf.mxu0 }
  0xcc   :  { %v415_v51 = vadd.f32 %v414_v41, %v392_v46 }
  0xce   :  { %v437_v42 = vpop.f32.mrf.mxu1 }
  0xcf   :  { %v460_v45 = vpop.f32.mrf.mxu2  ;;  %v438_v54 = vadd.f32 %v437_v42, %v415_v51 }
  0xd1   :  { %v461_v58 = vadd.f32 %v460_v45, %v438_v54 }
  0xd2   :  { %v483_v47 = vpop.f32.mrf.mxu3 }
  0xd3   :  { %v484_v61 = vadd.f32 %v483_v47, %v461_v58 }
  0xdd   :  { %v417_v48 = vpop.f32.mrf.mxu0 }
  0xde   :  { %v418_v56 = vadd.f32 %v417_v48, %v395_v52 }
  0xe0   :  { %v440_v50 = vpop.f32.mrf.mxu1 }
  0xe1   :  { %v441_v60 = vadd.f32 %v440_v50, %v418_v56 }
  0xe3   :  { %v463_v53 = vpop.f32.mrf.mxu2 }
  0xe4   :  { %v464_v63 = vadd.f32 %v463_v53, %v441_v60 }
  0xe6   :  { %v486_v55 = vpop.f32.mrf.mxu3 }
  0xe7   :  { %v506_v57 = vpop.f32.mrf.mxu0  ;;  %v487_v3 = vadd.f32 %v486_v55, %v464_v63 }
  0xe8   :  { %v507_v0 = vadd.f32 %v506_v57, %v484_v61 }
  0xea   :  { %v529_v59 = vpop.f32.mrf.mxu1 }
  0xeb   :  { %v530_v4 = vadd.f32 %v529_v59, %v507_v0 }
  0xed   :  { %v552_v62 = vpop.f32.mrf.mxu2 }
  0xee   :  { %v553_v6 = vadd.f32 %v552_v62, %v530_v4 }
  0xf0   :  { %v575_v1 = vpop.f32.mrf.mxu3 }
  0xf1   :  { %v509_v2 = vpop.f32.mrf.mxu0  ;;  %v576_v9 = vadd.f32 %v575_v1, %v553_v6 }
  0xf2   :  { %v510_v7 = vadd.f32 %v509_v2, %v487_v3 }
  0xf4   :  { %v532_v5 = vpop.f32.mrf.mxu1 }
  0xf5   :  { %v533_v12 = vadd.f32 %v532_v5, %v510_v7 }
  0xf7   :  { %v555_v8 = vpop.f32.mrf.mxu2 }
  0xf8   :  { %v556_v15 = vadd.f32 %v555_v8, %v533_v12 }
  0xfa   :  { %v578_v10 = vpop.f32.mrf.mxu3 }
  0xfb   :  { %v579_v18 = vadd.f32 %v578_v10, %v556_v15 }
 0x10b   :  { %v598_v11 = vpop.f32.mrf.mxu0 }
 0x10c   :  { %v599_v13 = vadd.f32 %v598_v11, %v576_v9 }
 0x10d   :  { %v621_v14 = vpop.f32.mrf.mxu1 }
 0x10e   :  { %v622_v16 = vadd.f32 %v621_v14, %v599_v13 }
 0x111   :  { %v644_v17 = vpop.f32.mrf.mxu2 }
 0x112   :  { %v645_v19 = vadd.f32 %v644_v17, %v622_v16 }
 0x113   :  { %v601_v21 = vpop.f32.mrf.mxu0  ;;  %v667_v22 = vpop.f32.mrf.mxu3 }
 0x114   :  { %v602_v23 = vadd.f32 %v601_v21, %v579_v18  ;;  %v668_v24 = vadd.f32 %v667_v22, %v645_v19 }
 0x115   :  { %v624_v25 = vpop.f32.mrf.mxu1 }
 0x116   :  { %v677_v26 = vadd.f32 %v846_v20, %v668_v24  ;;  %v625_v27 = vadd.f32 %v624_v25, %v602_v23 }
 0x118   :  { %679 = vst [vmem:[#allocation2] sm:$0xff] %v677_v26 }
 0x119   :  { %v647_v28 = vpop.f32.mrf.mxu2 }
 0x11a   :  { %v648_v29 = vadd.f32 %v647_v28, %v625_v27 }
 0x11b   :  { %v670_v30 = vpop.f32.mrf.mxu3 }
 0x11c   :  { %v671_v31 = vadd.f32 %v670_v30, %v648_v29 }
 0x11e   :  { %v678_v32 = vadd.f32 %v846_v20, %v671_v31 }
 0x120   :  { %680 = vst [vmem:[#allocation2 + $0x8] sm:$0xff] %v678_v32 }
 0x121   :  { %693 = dma.vmem_to_hbm [thread:$0]  %s686_s22, 256, %s688_s25, [#allocation3], %s874_s2, %s874_s2, %s875_s26  }
 0x122   :  { %871 = dma.done.wait [#allocation3], 256  }
 0x123   :  { %872 = vsyncadd [#allocation3], 4294967040 }
 0x124   :  { %698 = vsyncpa [#allocation3], 1 }

</bundles_post_ra>
